<compile_context>
chip_gen: v7x
topology: tpu7x:2x2x1
jax: 0.10.0
libtpu: 0.0.40
codegen_flags: <defaults>
</compile_context>

<pallas_src>
import math
import jax
import jax.numpy as jnp
from jax import lax
from jax.experimental import pallas as pl
from jax.experimental.pallas import tpu as pltpu

LANE = 128  # TPU lane width; all matmul dims are padded to multiples of this.


def _round_up(n, m):
    return ((n + m - 1) // m) * m


def mult_dae_kernel(x_ref,
                    we1_ref, be1_ref, we2_ref, be2_ref,
                    wd1_ref, bd1_ref, wd2_ref, bd2_ref,
                    o_ref):
    # --- L2 row-normalize (F.normalize(x, 2, 1), eps=1e-12), in f32 ---
    x = x_ref[...].astype(jnp.float32)
    sumsq = jnp.sum(x * x, axis=-1, keepdims=True)
    # rsqrt goes to the EUP (its own VLIW slot). Clamping the sum of squares at
    # eps^2 = 1e-24 preserves the max(||x||, 1e-12) semantics, incl. zero rows.
    x = x * lax.rsqrt(jnp.maximum(sumsq, 1e-24))

    # Dropout: identity at inference time.
    # TODO(synk): training-mode dropout (pltpu.prng_* mask + 1/(1-p) scale) not implemented.

    # Matmuls: bf16 operands, f32 accumulation; bias add / ReLU stay in f32.
    def dense(a_f32, w_ref, b_ref):
        acc = jnp.dot(a_f32.astype(jnp.bfloat16), w_ref[...],
                      preferred_element_type=jnp.float32)
        return acc + b_ref[...]

    h = jnp.maximum(dense(x, we1_ref, be1_ref), 0.0)   # encoder layer 1 + ReLU
    z = dense(h, we2_ref, be2_ref)                     # encoder layer 2 (latent)
    g = jnp.maximum(dense(z, wd1_ref, bd1_ref), 0.0)   # decoder layer 1 + ReLU
    out = dense(g, wd2_ref, bd2_ref)                   # decoder layer 2 (logits)

    o_ref[...] = out.astype(o_ref.dtype)


def prepare_params(params):
    """One-time prep: zero-pad all matmul dims (incl. D_in) to multiples of 128
    lanes and cast weights to bf16. Call once, reuse across forward calls.

    Zero padding is exact: padded bias entries are 0, so padded activation
    columns are exactly 0 (ReLU(0) = 0), and the corresponding zero rows of the
    next weight matrix contribute nothing to the true outputs. Padded logit
    columns are sliced off in the wrapper. Biases stay f32.
    """
    we1, be1 = params["we1"], params["be1"]
    we2, be2 = params["we2"], params["be2"]
    wd1, bd1 = params["wd1"], params["bd1"]
    wd2, bd2 = params["wd2"], params["bd2"]

    d_in, h1 = we1.shape
    lat = we2.shape[1]
    h2 = wd1.shape[1]
    d_pad, h1p, latp, h2p = (_round_up(n, LANE) for n in (d_in, h1, lat, h2))

    def pad2(w, rows, cols):
        return jnp.pad(w, ((0, rows - w.shape[0]), (0, cols - w.shape[1])))

    wdt = jnp.bfloat16
    return dict(
        we1=pad2(we1, d_pad, h1p).astype(wdt), be1=pad2(be1, 1, h1p),
        we2=pad2(we2, h1p, latp).astype(wdt), be2=pad2(be2, 1, latp),
        wd1=pad2(wd1, latp, h2p).astype(wdt), bd1=pad2(bd1, 1, h2p),
        wd2=pad2(wd2, h2p, d_pad).astype(wdt), bd2=pad2(bd2, 1, d_pad),
    )


def _pick_tm(B):
    """Batch tile size.

    * Tiny batches (< 32): single grid step — megacore split is not worth the
      ~0.35 us per-step overhead.
    * Otherwise: at least two grid steps (so dimension_semantics=('parallel',)
      can shard across both v7x TensorCores), capped at 256 rows to fill the
      2x256x256 MXU rows on v6e/v7x.
    """
    if B < 32:
        return B
    return min(256, _round_up(pl.cdiv(B, 2), 8))


def mult_dae_forward(x, prepared, *, tm=None, out_dtype=None):
    """x: (B, D_in) float32 or bfloat16.  prepared: output of prepare_params()."""
    B, D_in = x.shape
    D_pad = prepared["we1"].shape[0]
    out_dtype = x.dtype if out_dtype is None else jnp.dtype(out_dtype)

    if tm is None:
        tm = _pick_tm(B)
    B_pad = _round_up(B, tm)

    xk = x
    if B_pad != B or D_pad != D_in:
        # Zero padding is exact: zero rows normalize to zero (clamped rsqrt
        # stays finite), zero item columns meet zero we1 rows.
        xk = jnp.pad(x, ((0, B_pad - B), (0, D_pad - D_in)))

    we1, be1 = prepared["we1"], prepared["be1"]
    we2, be2 = prepared["we2"], prepared["be2"]
    wd1, bd1 = prepared["wd1"], prepared["bd1"]
    wd2, bd2 = prepared["wd2"], prepared["bd2"]

    def resident_spec(arr):
        # Whole-array block, same block every grid step, single-buffered:
        # weights stay VMEM resident with no double-buffer copy.
        return pl.BlockSpec(arr.shape, lambda i: (0, 0),
                            pipeline_mode=pl.Buffered(1))

    h1p, latp, h2p = we1.shape[1], we2.shape[1], wd1.shape[1]
    flops = 2 * B_pad * (D_pad * h1p + h1p * latp + latp * h2p + h2p * D_pad)
    weight_bytes = sum(int(a.size) * a.dtype.itemsize
                       for a in (we1, be1, we2, be2, wd1, bd1, wd2, bd2))
    io_bytes = B_pad * D_pad * (x.dtype.itemsize + out_dtype.itemsize)
    cost = pl.CostEstimate(flops=int(flops), transcendentals=int(B_pad),
                           bytes_accessed=int(weight_bytes + io_bytes))

    # VMEM budget: single-buffered weights + double-buffered x/out tiles +
    # headroom for f32 intermediates and compiler-internal scratch.
    tile_bytes = 2 * tm * D_pad * (x.dtype.itemsize + out_dtype.itemsize)
    inter_bytes = 4 * tm * max(h1p, latp, h2p, D_pad) * 4
    vmem_limit = int(min(max(weight_bytes + tile_bytes + inter_bytes + (8 << 20),
                             16 << 20),
                         128 << 20))

    out_padded = pl.pallas_call(
        mult_dae_kernel,
        out_shape=jax.ShapeDtypeStruct((B_pad, D_pad), out_dtype),
        grid_spec=pltpu.PrefetchScalarGridSpec(
            num_scalar_prefetch=0,
            grid=(B_pad // tm,),
            in_specs=[
                pl.BlockSpec((tm, D_pad), lambda i: (i, 0)),  # x (batch-tiled)
                resident_spec(we1), resident_spec(be1),
                resident_spec(we2), resident_spec(be2),
                resident_spec(wd1), resident_spec(bd1),
                resident_spec(wd2), resident_spec(bd2),
            ],
            out_specs=pl.BlockSpec((tm, D_pad), lambda i: (i, 0)),  # lane-dense
        ),
        compiler_params=pltpu.CompilerParams(
            dimension_semantics=("parallel",),
            vmem_limit_bytes=vmem_limit),
        cost_estimate=cost,
    )(xk, we1, be1, we2, be2, wd1, bd1, wd2, bd2)

    if B_pad != B or D_pad != D_in:
        out_padded = out_padded[:B, :D_in]
    return out_padded


def init_params(key, encoder_dims):
    """Xavier-normal(gain=5/3) weights, bias=0.01 (matches _init_weights).

    Weights stored as (in, out), f32; padding / bf16 cast happens in
    prepare_params (once).
    """
    decoder_dims = encoder_dims[::-1]
    gain = 5.0 / 3.0  # nn.init.calculate_gain('tanh')

    def linear(key, d_in, d_out):
        std = gain * math.sqrt(2.0 / (d_in + d_out))
        w = std * jax.random.normal(key, (d_in, d_out), dtype=jnp.float32)
        b = jnp.full((1, d_out), 0.01, dtype=jnp.float32)
        return w, b

    keys = jax.random.split(key, 4)
    we1, be1 = linear(keys[0], encoder_dims[0], encoder_dims[1])
    we2, be2 = linear(keys[1], encoder_dims[1], encoder_dims[2])
    wd1, bd1 = linear(keys[2], decoder_dims[0], decoder_dims[1])
    wd2, bd2 = linear(keys[3], decoder_dims[1], decoder_dims[2])
    return dict(we1=we1, be1=be1, we2=we2, be2=be2,
                wd1=wd1, bd1=bd1, wd2=wd2, bd2=bd2)


def reference_forward(x, params):
    """Pure-JAX reference on the unpadded weights, with the same bf16-operand /
    f32-accumulation matmul numerics as the kernel."""
    def mm(a, w, b):
        return jnp.dot(a.astype(jnp.bfloat16), w.astype(jnp.bfloat16),
                       preferred_element_type=jnp.float32) + b

    xf = x.astype(jnp.float32)
    xn = xf * lax.rsqrt(jnp.maximum(jnp.sum(xf * xf, axis=1, keepdims=True), 1e-24))
    h = jnp.maximum(mm(xn, params["we1"], params["be1"]), 0.0)
    z = mm(h, params["we2"], params["be2"])
    g = jnp.maximum(mm(z, params["wd1"], params["bd1"]), 0.0)
    return mm(g, params["wd2"], params["bd2"])


if __name__ == "__main__":
    encoder_dims = [256, 128, 64]   # input items -> hidden -> latent (64 pads to 128)
    B = 16

    key = jax.random.PRNGKey(0)
    k_x, k_p = jax.random.split(key)
    # Non-negative "interaction count"-like input, like a user-item count matrix.
    x = jax.random.uniform(k_x, (B, encoder_dims[0]), dtype=jnp.float32)
    params = init_params(k_p, encoder_dims)

    # One-time param prep (pad + bf16 cast), hoisted out of the forward path.
    prepared = prepare_params(params)
    prepared = jax.block_until_ready(prepared)

    out = mult_dae_forward(x, prepared)
    out = jax.block_until_ready(out)

    ref = reference_forward(x, params)
    assert out.shape == (B, encoder_dims[0])
    assert out.dtype == x.dtype
    assert jnp.allclose(out, ref, atol=1e-2, rtol=1e-2), "mismatch vs reference"

    print("KERNEL_OK")
</pallas_src>

<mosaic_0001>
module attributes {stable_mosaic.version = 11 : i64} {
  func.func @mult_dae_kernel(%arg0: i32, %arg1: memref<16x256xf32, #tpu.memory_space<vmem>>, %arg2: memref<256x128xbf16, #tpu.memory_space<vmem>>, %arg3: memref<1x128xf32, #tpu.memory_space<vmem>>, %arg4: memref<128x128xbf16, #tpu.memory_space<vmem>>, %arg5: memref<1x128xf32, #tpu.memory_space<vmem>>, %arg6: memref<128x128xbf16, #tpu.memory_space<vmem>>, %arg7: memref<1x128xf32, #tpu.memory_space<vmem>>, %arg8: memref<128x256xbf16, #tpu.memory_space<vmem>>, %arg9: memref<1x256xf32, #tpu.memory_space<vmem>>, %arg10: memref<16x256xf32, #tpu.memory_space<vmem>>) attributes {dimension_semantics = [#tpu.dimension_semantics<parallel>], iteration_bounds = array<i64: 1>, scalar_prefetch = 0 : i64, scratch_operands = 0 : i64, tpu.core_type = #tpu.core_type<tc>, window_params = [{transform_indices = @transform_0, window_bounds = array<i64: 16, 256>}, {pipeline_mode = #tpu.pipeline_mode<synchronous>, transform_indices = @transform_1, window_bounds = array<i64: 256, 128>}, {pipeline_mode = #tpu.pipeline_mode<synchronous>, transform_indices = @transform_2, window_bounds = array<i64: 1, 128>}, {pipeline_mode = #tpu.pipeline_mode<synchronous>, transform_indices = @transform_3, window_bounds = array<i64: 128, 128>}, {pipeline_mode = #tpu.pipeline_mode<synchronous>, transform_indices = @transform_4, window_bounds = array<i64: 1, 128>}, {pipeline_mode = #tpu.pipeline_mode<synchronous>, transform_indices = @transform_5, window_bounds = array<i64: 128, 128>}, {pipeline_mode = #tpu.pipeline_mode<synchronous>, transform_indices = @transform_6, window_bounds = array<i64: 1, 128>}, {pipeline_mode = #tpu.pipeline_mode<synchronous>, transform_indices = @transform_7, window_bounds = array<i64: 128, 256>}, {pipeline_mode = #tpu.pipeline_mode<synchronous>, transform_indices = @transform_8, window_bounds = array<i64: 1, 256>}, {transform_indices = @transform_9, window_bounds = array<i64: 16, 256>}]} {
    %c0 = arith.constant 0 : index
    %c0_0 = arith.constant 0 : index
    %0 = vector.load %arg1[%c0, %c0_0] : memref<16x256xf32, #tpu.memory_space<vmem>>, vector<16x256xf32>
    %1 = arith.mulf %0, %0 : vector<16x256xf32>
    %cst = arith.constant dense<0.000000e+00> : vector<16xf32>
    %2 = vector.multi_reduction <add>, %1, %cst [1] : vector<16x256xf32> to vector<16xf32>
    %3 = vector.shape_cast %2 : vector<16xf32> to vector<16x1xf32>
    %cst_1 = arith.constant 1.000000e-24 : f32
    %4 = vector.broadcast %cst_1 : f32 to vector<16x1xf32>
    %5 = arith.maximumf %3, %4 : vector<16x1xf32>
    %6 = math.rsqrt %5 : vector<16x1xf32>
    %7 = vector.broadcast %6 : vector<16x1xf32> to vector<16x256xf32>
    %8 = arith.mulf %0, %7 : vector<16x256xf32>
    %9 = arith.truncf %8 : vector<16x256xf32> to vector<16x256xbf16>
    %c0_2 = arith.constant 0 : index
    %c0_3 = arith.constant 0 : index
    %10 = vector.load %arg2[%c0_2, %c0_3] : memref<256x128xbf16, #tpu.memory_space<vmem>>, vector<256x128xbf16>
    %cst_4 = arith.constant dense<0.000000e+00> : vector<16x128xf32>
    %11 = tpu.matmul %9, %10, %cst_4 {dimension_numbers = #tpu.dot_dimension_numbers<[1], [0], [0], [1], [0, 0, 1, 1], [], []>} : vector<16x256xbf16>, vector<256x128xbf16>, vector<16x128xf32> -> vector<16x128xf32>
    %c0_5 = arith.constant 0 : index
    %c0_6 = arith.constant 0 : index
    %12 = vector.load %arg3[%c0_5, %c0_6] : memref<1x128xf32, #tpu.memory_space<vmem>>, vector<1x128xf32>
    %13 = vector.broadcast %12 : vector<1x128xf32> to vector<16x128xf32>
    %14 = arith.addf %11, %13 : vector<16x128xf32>
    %cst_7 = arith.constant 0.000000e+00 : f32
    %15 = vector.broadcast %cst_7 : f32 to vector<16x128xf32>
    %16 = arith.maximumf %14, %15 : vector<16x128xf32>
    %17 = arith.truncf %16 : vector<16x128xf32> to vector<16x128xbf16>
    %c0_8 = arith.constant 0 : index
    %c0_9 = arith.constant 0 : index
    %18 = vector.load %arg4[%c0_8, %c0_9] : memref<128x128xbf16, #tpu.memory_space<vmem>>, vector<128x128xbf16>
    %cst_10 = arith.constant dense<0.000000e+00> : vector<16x128xf32>
    %19 = tpu.matmul %17, %18, %cst_10 {dimension_numbers = #tpu.dot_dimension_numbers<[1], [0], [0], [1], [0, 0, 1, 1], [], []>} : vector<16x128xbf16>, vector<128x128xbf16>, vector<16x128xf32> -> vector<16x128xf32>
    %c0_11 = arith.constant 0 : index
    %c0_12 = arith.constant 0 : index
    %20 = vector.load %arg5[%c0_11, %c0_12] : memref<1x128xf32, #tpu.memory_space<vmem>>, vector<1x128xf32>
    %21 = vector.broadcast %20 : vector<1x128xf32> to vector<16x128xf32>
    %22 = arith.addf %19, %21 : vector<16x128xf32>
    %23 = arith.truncf %22 : vector<16x128xf32> to vector<16x128xbf16>
    %c0_13 = arith.constant 0 : index
    %c0_14 = arith.constant 0 : index
    %24 = vector.load %arg6[%c0_13, %c0_14] : memref<128x128xbf16, #tpu.memory_space<vmem>>, vector<128x128xbf16>
    %cst_15 = arith.constant dense<0.000000e+00> : vector<16x128xf32>
    %25 = tpu.matmul %23, %24, %cst_15 {dimension_numbers = #tpu.dot_dimension_numbers<[1], [0], [0], [1], [0, 0, 1, 1], [], []>} : vector<16x128xbf16>, vector<128x128xbf16>, vector<16x128xf32> -> vector<16x128xf32>
    %c0_16 = arith.constant 0 : index
    %c0_17 = arith.constant 0 : index
    %26 = vector.load %arg7[%c0_16, %c0_17] : memref<1x128xf32, #tpu.memory_space<vmem>>, vector<1x128xf32>
    %27 = vector.broadcast %26 : vector<1x128xf32> to vector<16x128xf32>
    %28 = arith.addf %25, %27 : vector<16x128xf32>
    %cst_18 = arith.constant 0.000000e+00 : f32
    %29 = vector.broadcast %cst_18 : f32 to vector<16x128xf32>
    %30 = arith.maximumf %28, %29 : vector<16x128xf32>
    %31 = arith.truncf %30 : vector<16x128xf32> to vector<16x128xbf16>
    %c0_19 = arith.constant 0 : index
    %c0_20 = arith.constant 0 : index
    %32 = vector.load %arg8[%c0_19, %c0_20] : memref<128x256xbf16, #tpu.memory_space<vmem>>, vector<128x256xbf16>
    %cst_21 = arith.constant dense<0.000000e+00> : vector<16x256xf32>
    %33 = tpu.matmul %31, %32, %cst_21 {dimension_numbers = #tpu.dot_dimension_numbers<[1], [0], [0], [1], [0, 0, 1, 1], [], []>} : vector<16x128xbf16>, vector<128x256xbf16>, vector<16x256xf32> -> vector<16x256xf32>
    %c0_22 = arith.constant 0 : index
    %c0_23 = arith.constant 0 : index
    %34 = vector.load %arg9[%c0_22, %c0_23] : memref<1x256xf32, #tpu.memory_space<vmem>>, vector<1x256xf32>
    %35 = vector.broadcast %34 : vector<1x256xf32> to vector<16x256xf32>
    %36 = arith.addf %33, %35 : vector<16x256xf32>
    %c0_24 = arith.constant 0 : index
    %c0_25 = arith.constant 0 : index
    %37 = vector.load %arg10[%c0_24, %c0_25] : memref<16x256xf32, #tpu.memory_space<vmem>>, vector<16x256xf32>
    tpu.vector_store %arg10[%c0_24, %c0_25], %36 {strides = array<i32>} : memref<16x256xf32, #tpu.memory_space<vmem>>, vector<16x256xf32>,
    return
  }
  func.func @transform_0(%arg0: i32) -> (i32, i32) {
    %c0_i32 = arith.constant 0 : i32
    %c0_i32_0 = arith.constant 0 : i32
    return %arg0, %c0_i32 : i32, i32
  }
  func.func @transform_1(%arg0: i32) -> (i32, i32) {
    %c0_i32 = arith.constant 0 : i32
    %c0_i32_0 = arith.constant 0 : i32
    %c0_i32_1 = arith.constant 0 : i32
    return %c0_i32, %c0_i32_0 : i32, i32
  }
  func.func @transform_2(%arg0: i32) -> (i32, i32) {
    %c0_i32 = arith.constant 0 : i32
    %c0_i32_0 = arith.constant 0 : i32
    %c0_i32_1 = arith.constant 0 : i32
    return %c0_i32, %c0_i32_0 : i32, i32
  }
  func.func @transform_3(%arg0: i32) -> (i32, i32) {
    %c0_i32 = arith.constant 0 : i32
    %c0_i32_0 = arith.constant 0 : i32
    %c0_i32_1 = arith.constant 0 : i32
    return %c0_i32, %c0_i32_0 : i32, i32
  }
  func.func @transform_4(%arg0: i32) -> (i32, i32) {
    %c0_i32 = arith.constant 0 : i32
    %c0_i32_0 = arith.constant 0 : i32
    %c0_i32_1 = arith.constant 0 : i32
    return %c0_i32, %c0_i32_0 : i32, i32
  }
  func.func @transform_5(%arg0: i32) -> (i32, i32) {
    %c0_i32 = arith.constant 0 : i32
    %c0_i32_0 = arith.constant 0 : i32
    %c0_i32_1 = arith.constant 0 : i32
    return %c0_i32, %c0_i32_0 : i32, i32
  }
  func.func @transform_6(%arg0: i32) -> (i32, i32) {
    %c0_i32 = arith.constant 0 : i32
    %c0_i32_0 = arith.constant 0 : i32
    %c0_i32_1 = arith.constant 0 : i32
    return %c0_i32, %c0_i32_0 : i32, i32
  }
  func.func @transform_7(%arg0: i32) -> (i32, i32) {
    %c0_i32 = arith.constant 0 : i32
    %c0_i32_0 = arith.constant 0 : i32
    %c0_i32_1 = arith.constant 0 : i32
    return %c0_i32, %c0_i32_0 : i32, i32
  }
  func.func @transform_8(%arg0: i32) -> (i32, i32) {
    %c0_i32 = arith.constant 0 : i32
    %c0_i32_0 = arith.constant 0 : i32
    %c0_i32_1 = arith.constant 0 : i32
    return %c0_i32, %c0_i32_0 : i32, i32
  }
  func.func @transform_9(%arg0: i32) -> (i32, i32) {
    %c0_i32 = arith.constant 0 : i32
    %c0_i32_0 = arith.constant 0 : i32
    return %arg0, %c0_i32 : i32, i32
  }
}

</mosaic_0001>

<bundles_post_ra>
// kernel: tpu_custom_call.1
= control target key start
LH: loop header
LB: loop body
LE: loop exit
PB: predicated region body
PF: predicated region fallthrough
CT: control target
= control target key end

     0   :  { %14 = vsyncpa [#allocation3], 0  ;;  %s1255_s0 = inlined_call_operand.hbm [shape: f32[16,256], index: 0, kind: input, shape index: {}]   ;;  %s1256_s1 = inlined_call_operand.hbm [shape: bf16[256,128], index: 1, kind: input, shape index: {}]   ;;  %s1257_s2 = inlined_call_operand.vmem [shape: f32[1,128], index: 2, kind: input, shape index: {}]   ;;  %s1258_s3 = inlined_call_operand.hbm [shape: bf16[128,128], index: 3, kind: input, shape index: {}]   ;;  %s1259_s4 = inlined_call_operand.vmem [shape: f32[1,128], index: 4, kind: input, shape index: {}]   ;;  %s1260_s5 = inlined_call_operand.hbm [shape: bf16[128,128], index: 5, kind: input, shape index: {}]   ;;  %s1261_s6 = inlined_call_operand.vmem [shape: f32[1,128], index: 6, kind: input, shape index: {}]   ;;  %s1262_s7 = inlined_call_operand.hbm [shape: bf16[128,256], index: 7, kind: input, shape index: {}]   ;;  %s1263_s8 = inlined_call_operand.vmem [shape: f32[1,256], index: 8, kind: input, shape index: {}]   ;;  %s1264_s9 = inlined_call_operand.hbm [shape: f32[16,256], index: 9, kind: output, shape index: {}]  }
   0x1   :  { %15 = vsyncpa [#allocation6], 0 }
   0x2   :  { %16 = vsyncpa [#allocation9], 0 }
   0x3   :  { %17 = vsyncpa [#allocation4], 0  ;;  %s1053_s30 = smov [#allocation5]   ;;  %s913_s13 = scalar_lea.hbm %s1256_s1, 2048 }
   0x4   :  { %s35_s10 = sshll.u32 %s1053_s30, 4  ;;  %p914_p0 = scmp.ne.s32.totalorder %s1256_s1, %s913_s13  ;;  %s36_s10 = int_to_ptr.vmem [resolvable:$true] %s35_s10 }
   0x5   :  { %p917_p1 = scmp.lt.u32.totalorder %s913_s13, %s1256_s1 }
   0x7   :  { %p919_p2 = pnand %p917_p1, %p914_p0 }
   0x9   :  { %922 = shalt.err (!%p919_p2)
}
   0xa   :  { %s923_s18 = scalar_lea.vmem %s36_s10, 2048  ;;  %p928_p4 = scmp.lt.s32.totalorder %s36_s10, %s36_s10 }
   0xb   :  { %p924_p3 = scmp.ne.s32.totalorder %s36_s10, %s923_s18  ;;  %p929_p5 = scmp.lt.s32.totalorder %s923_s18, %s923_s18 }
   0xd   :  { %p930_p6 = por %p929_p5, %p928_p4 }
   0xf   :  { %p931_p7 = pnand %p930_p6, %p924_p3 }
  0x11   :  { %934 = shalt.err (!%p931_p7)
}
  0x12   :  { %s1054_s19 = smov 64   ;;  %s1055_s20 = smov 4  }
  0x13   :  { %41 = dma.hbm_to_vmem [thread:$0]  %s1256_s1, 2048, %s36_s10, [#allocation6], %s1054_s19, %s1054_s19, %s1055_s20  }
  0x14   :  { %s1056_s23 = smov [#allocation8]   ;;  %s1057_s25 = smov [#allocation2]  }
  0x15   :  { %s63_s24 = sshll.u32 %s1056_s23, 4  ;;  %s23_s26 = sshll.u32 %s1057_s25, 4  ;;  %s64_s24 = int_to_ptr.vmem [resolvable:$true] %s63_s24  ;;  %s24_s26 = int_to_ptr.vmem [resolvable:$true] %s23_s26 }
  0x16   :  { %s935_s29 = scalar_lea.hbm %s1260_s5, 1024 }
  0x17   :  { %p936_p8 = scmp.ne.s32.totalorder %s1260_s5, %s935_s29  ;;  %p939_p9 = scmp.lt.u32.totalorder %s935_s29, %s1260_s5 }
  0x19   :  { %p941_p10 = pnand %p939_p9, %p936_p8 }
  0x1b   :  { %944 = shalt.err (!%p941_p10)
}
  0x1c   :  { %s945_s1 = scalar_lea.vmem %s64_s24, 1024  ;;  %p950_p12 = scmp.lt.s32.totalorder %s64_s24, %s64_s24 }
  0x1d   :  { %p946_p11 = scmp.ne.s32.totalorder %s64_s24, %s945_s1  ;;  %p951_p13 = scmp.lt.s32.totalorder %s945_s1, %s945_s1 }
  0x1f   :  { %p952_p0 = por %p951_p13, %p950_p12 }
  0x21   :  { %p953_p1 = pnand %p952_p0, %p946_p11 }
  0x23   :  { %956 = shalt.err (!%p953_p1)
}
  0x24   :  { %69 = dma.hbm_to_vmem [thread:$0]  %s1260_s5, 1024, %s64_s24, [#allocation9], %s1054_s19, %s1054_s19, %s1055_s20  }
  0x25   :  { %s957_s17 = scalar_lea.hbm %s1255_s0, 512 }
  0x26   :  { %p958_p2 = scmp.ne.s32.totalorder %s1255_s0, %s957_s17  ;;  %p961_p3 = scmp.lt.u32.totalorder %s957_s17, %s1255_s0 }
  0x28   :  { %p963_p4 = pnand %p961_p3, %p958_p2 }
  0x2a   :  { %966 = shalt.err (!%p963_p4)
}
  0x2b   :  { %s967_s25 = scalar_lea.vmem %s24_s26, 512  ;;  %p972_p6 = scmp.lt.s32.totalorder %s24_s26, %s24_s26 }
  0x2c   :  { %p968_p5 = scmp.ne.s32.totalorder %s24_s26, %s967_s25  ;;  %p973_p7 = scmp.lt.s32.totalorder %s967_s25, %s967_s25 }
  0x2e   :  { %p974_p8 = por %p973_p7, %p972_p6 }
  0x30   :  { %p975_p9 = pnand %p974_p8, %p968_p5 }
  0x32   :  { %978 = shalt.err (!%p975_p9)
}
  0x33   :  { %s1058_s5 = smov 256   ;;  %s1059_s24 = smov 16  }
  0x34   :  { %29 = dma.hbm_to_vmem [thread:$0]  %s1255_s0, 512, %s24_s26, [#allocation3], %s1058_s5, %s1058_s5, %s1059_s24  }
  0x35   :  { %s1060_s29 = smov [#allocation7]   ;;  %s1061_s11 = smov [#allocation10]  }
  0x36   :  { %s49_s30 = sshll.u32 %s1060_s29, 4  ;;  %s77_s12 = sshll.u32 %s1061_s11, 4  ;;  %s50_s30 = int_to_ptr.vmem [resolvable:$true] %s49_s30  ;;  %s78_s12 = int_to_ptr.vmem [resolvable:$true] %s77_s12 }
  0x37   :  { %s979_s10 = scalar_lea.hbm %s1258_s3, 1024 }
  0x38   :  { %p980_p10 = scmp.ne.s32.totalorder %s1258_s3, %s979_s10  ;;  %p983_p11 = scmp.lt.u32.totalorder %s979_s10, %s1258_s3 }
  0x3a   :  { %p985_p12 = pnand %p983_p11, %p980_p10 }
  0x3c   :  { %988 = shalt.err (!%p985_p12)
}
  0x3d   :  { %s989_s0 = scalar_lea.vmem %s50_s30, 1024  ;;  %p994_p0 = scmp.lt.s32.totalorder %s50_s30, %s50_s30 }
  0x3e   :  { %p990_p13 = scmp.ne.s32.totalorder %s50_s30, %s989_s0  ;;  %p995_p1 = scmp.lt.s32.totalorder %s989_s0, %s989_s0 }
  0x40   :  { %p996_p2 = por %p995_p1, %p994_p0 }
  0x42   :  { %p997_p3 = pnand %p996_p2, %p990_p13 }
  0x44   :  { %1000 = shalt.err (!%p997_p3)
}
  0x45   :  { %55 = dma.hbm_to_vmem [thread:$0]  %s1258_s3, 1024, %s50_s30, [#allocation6], %s1054_s19, %s1054_s19, %s1055_s20  }
  0x46   :  { %s1001_s23 = scalar_lea.hbm %s1262_s7, 2048 }
  0x47   :  { %p1002_p4 = scmp.ne.s32.totalorder %s1262_s7, %s1001_s23  ;;  %p1005_p5 = scmp.lt.u32.totalorder %s1001_s23, %s1262_s7 }
  0x49   :  { %p1007_p6 = pnand %p1005_p5, %p1002_p4 }
  0x4b   :  { %1010 = shalt.err (!%p1007_p6)
}
  0x4c   :  { %s1011_s11 = scalar_lea.vmem %s78_s12, 2048  ;;  %p1016_p8 = scmp.lt.s32.totalorder %s78_s12, %s78_s12 }
  0x4d   :  { %p1012_p7 = scmp.ne.s32.totalorder %s78_s12, %s1011_s11  ;;  %p1017_p9 = scmp.lt.s32.totalorder %s1011_s11, %s1011_s11 }
  0x4f   :  { %p1018_p10 = por %p1017_p9, %p1016_p8 }
  0x51   :  { %p1019_p11 = pnand %p1018_p10, %p1012_p7 }
  0x53   :  { %1022 = shalt.err (!%p1019_p11)
}
  0x54   :  { %s1062_s3 = smov 128   ;;  %s1063_s19 = smov 8  }
  0x55   :  { %83 = dma.hbm_to_vmem [thread:$0]  %s1262_s7, 2048, %s78_s12, [#allocation9], %s1062_s3, %s1062_s3, %s1063_s19  }
  0x56   :  { %1045 = dma.done.wait [#allocation3], 512  }
  0x57   :  { %1046 = vsyncadd [#allocation3], 4294966784 }
  0x58   :  { %1047 = dma.done.wait [#allocation6], 3072  }
  0x59   :  { %1048 = vsyncadd [#allocation6], 4294964224 }
  0x5a   :  { %1049 = dma.done.wait [#allocation9], 3072  }
  0x5b   :  { %1050 = vsyncadd [#allocation9], 4294964224  ;;  %v1190_v0 = vld [vmem:[#allocation2] sm:$0xff]  ;;  %v1192_v1 = vld [vmem:[#allocation2 + $0x8] sm:$0xff]  ;;  %v1064_v27 = vmov 0.0   ;;  %vm1065_vm0 = vmmov 0  }
  0x5c   :  { %v1194_v2 = vld [vmem:[#allocation2 + $0x10] sm:$0xff]  ;;  %v106_v3 = vmul.f32 %v1190_v0, %v1190_v0  ;;  %v107_v4 = vmul.f32 %v1192_v1, %v1192_v1  ;;  %v1200_v5 = vld [vmem:[#allocation2 + $0x18] sm:$0xff]  ;;  %v853_v8 = vld [vmem:[#allocation5 + $0x40] sm:$0xff]   ;;  %798 = vmatprep.subr.bf16.mxu1 %v1064_v27  ;;  %814 = vmatprep.mubr.msk.bf16.mxu1 %vm1065_vm0, %v1064_v27 }
  0x5d   :  { %v108_v6 = vmul.f32 %v1194_v2, %v1194_v2  ;;  %v109_v7 = vmul.f32 %v1200_v5, %v1200_v5  ;;  %v854_v10 = vld [vmem:[#allocation5] sm:$0xff]   ;;  %758 = vmatprep.subr.bf16.mxu0 %v853_v8  ;;  %v855_v11 = vld [vmem:[#allocation5 + $0x48] sm:$0xff]   ;;  %v857_v14 = vld [vmem:[#allocation5 + $0x50] sm:$0xff]  }
  0x5e   :  { %v110_v9 = vadd.f32 %v107_v4, %v106_v3  ;;  %759 = vmatpush3.bf16.msra.mxu0 %v854_v10  ;;  %v856_v13 = vld [vmem:[#allocation5 + $0x8] sm:$0xff]   ;;  %v858_v15 = vld [vmem:[#allocation5 + $0x10] sm:$0xff]   ;;  %v859_v16 = vld [vmem:[#allocation5 + $0x58] sm:$0xff]  }
  0x5f   :  { %v113_v12 = vadd.f32 %v109_v7, %v108_v6  ;;  %760 = vmatprep.subr.bf16.mxu0 %v855_v11  ;;  %v860_v17 = vld [vmem:[#allocation5 + $0x18] sm:$0xff]   ;;  %v861_v18 = vld [vmem:[#allocation5 + $0x60] sm:$0xff]   ;;  %v863_v20 = vld [vmem:[#allocation5 + $0x68] sm:$0xff]  }
  0x60   :  { %111 = vadd.xlane.f32.xlu0 %v110_v9  ;;  %v862_v19 = vld [vmem:[#allocation5 + $0x20] sm:$0xff]   ;;  %v864_v21 = vld [vmem:[#allocation5 + $0x28] sm:$0xff]   ;;  %v865_v22 = vld [vmem:[#allocation5 + $0x70] sm:$0xff]  }
  0x61   :  { %v866_v23 = vld [vmem:[#allocation5 + $0x30] sm:$0xff]   ;;  %v867_v24 = vld [vmem:[#allocation5 + $0x78] sm:$0xff]   ;;  %v869_v26 = vld [vmem:[#allocation7] sm:$0xff]  }
  0x62   :  { %761 = vmatpush3.bf16.msra.mxu0 %v856_v13  ;;  %v868_v25 = vld [vmem:[#allocation5 + $0x38] sm:$0xff]   ;;  %799 = vmatpush3.bf16.msra.mxu1 %v869_v26  ;;  %v870_v28 = vld [vmem:[#allocation7 + $0x8] sm:$0xff]   ;;  %v871_v29 = vld [vmem:[#allocation7 + $0x10] sm:$0xff]  }
  0x63   :  { %762 = vmatprep.subr.bf16.mxu0 %v857_v14  ;;  %800 = vmatprep.subr.bf16.mxu1 %v1064_v27  ;;  %v872_v30 = vld [vmem:[#allocation7 + $0x18] sm:$0xff]   ;;  %v873_v31 = vld [vmem:[#allocation7 + $0x20] sm:$0xff]   ;;  %v874_v44 = vld [vmem:[#allocation7 + $0x28] sm:$0xff]  }
  0x64   :  { %114 = vadd.xlane.f32.xlu0 %v113_v12  ;;  %v875_v45 = vld [vmem:[#allocation7 + $0x30] sm:$0xff]   ;;  %v876_v46 = vld [vmem:[#allocation7 + $0x38] sm:$0xff]   ;;  %v877_v47 = vld [vmem:[#allocation8] sm:$0xff]  }
  0x65   :  { %v878_v48 = vld [vmem:[#allocation8 + $0x8] sm:$0xff]   ;;  %v879_v49 = vld [vmem:[#allocation8 + $0x10] sm:$0xff]   ;;  %v880_v50 = vld [vmem:[#allocation8 + $0x18] sm:$0xff]  }
  0x66   :  { %763 = vmatpush3.bf16.msra.mxu0 %v858_v15  ;;  %801 = vmatpush3.bf16.msra.mxu1 %v870_v28  ;;  %v881_v51 = vld [vmem:[#allocation8 + $0x20] sm:$0xff]   ;;  %v882_v52 = vld [vmem:[#allocation8 + $0x28] sm:$0xff]   ;;  %v888_v6 = vld [vmem:[#allocation10 + $0x10] ss:$8 sps:$4 sm:$0xff]  }
  0x67   :  { %764 = vmatprep.subr.bf16.mxu0 %v859_v16  ;;  %802 = vmatprep.subr.bf16.mxu1 %v1064_v27  ;;  %v707_v54 = vld [vmem:[%s1257_s2] ss:$0 sm:$0xff]  ;;  %v887_v4 = vld [vmem:[#allocation10 + $0x4] ss:$8 sps:$4 sm:$0xff]   ;;  %v896_v9 = vld [vmem:[#allocation10 + $0x34] ss:$8 sps:$4 sm:$0xff]  }
  0x68   :  { %v885_v3 = vld [vmem:[#allocation10] ss:$8 sps:$4 sm:$0xff]   ;;  %v893_v7 = vld [vmem:[#allocation10 + $0x24] ss:$8 sps:$4 sm:$0xff]   ;;  %v894_v10 = vld [vmem:[#allocation10 + $0x30] ss:$8 sps:$4 sm:$0xff]  }
  0x69   :  { %v891_v8 = vld [vmem:[#allocation10 + $0x20] ss:$8 sps:$4 sm:$0xff]   ;;  %v899_v11 = vld [vmem:[#allocation10 + $0x44] ss:$8 sps:$4 sm:$0xff]   ;;  %v902_v13 = vld [vmem:[#allocation10 + $0x54] ss:$8 sps:$4 sm:$0xff]  }
  0x6a   :  { %765 = vmatpush3.bf16.msra.mxu0 %v860_v17  ;;  %803 = vmatpush3.bf16.msra.mxu1 %v871_v29  ;;  %v897_v12 = vld [vmem:[#allocation10 + $0x40] ss:$8 sps:$4 sm:$0xff]   ;;  %v900_v14 = vld [vmem:[#allocation10 + $0x50] ss:$8 sps:$4 sm:$0xff]  }
  0x6b   :  { %766 = vmatprep.subr.bf16.mxu0 %v861_v18  ;;  %804 = vmatprep.subr.bf16.mxu1 %v1064_v27  ;;  %v724_v15 = vld [vmem:[%s1259_s4] ss:$0 sm:$0xff]  ;;  %v906_v26 = vld [vmem:[#allocation10 + $0x70] ss:$8 sps:$4 sm:$0xff]  }
  0x6c   :  { %v733_v28 = vld [vmem:[%s1261_s6] ss:$0 sm:$0xff]  ;;  %s1067_s6 = smov [#allocation11]  }
  0x6d   :  { %s693_s15 = sshll.u32 %s1067_s6, 4  ;;  %s694_s15 = int_to_ptr.vmem [resolvable:$true] %s693_s15 }
  0x6e   :  { %767 = vmatpush3.bf16.msra.mxu0 %v862_v19  ;;  %805 = vmatpush3.bf16.msra.mxu1 %v872_v30  ;;  %s1023_s16 = scalar_lea.vmem %s694_s15, 512  ;;  %p1028_p13 = scmp.lt.s32.totalorder %s694_s15, %s694_s15 }
  0x6f   :  { %768 = vmatprep.subr.bf16.mxu0 %v863_v20  ;;  %806 = vmatprep.subr.bf16.mxu1 %v1064_v27  ;;  %p1024_p12 = scmp.ne.s32.totalorder %s694_s15, %s1023_s16  ;;  %p1029_p0 = scmp.lt.s32.totalorder %s1023_s16, %s1023_s16 }
  0x71   :  { %p1030_p1 = por %p1029_p0, %p1028_p13 }
  0x72   :  { %769 = vmatpush3.bf16.msra.mxu0 %v864_v21  ;;  %807 = vmatpush3.bf16.msra.mxu1 %v873_v31 }
  0x73   :  { %770 = vmatprep.subr.bf16.mxu0 %v865_v22  ;;  %808 = vmatprep.subr.bf16.mxu1 %v1064_v27  ;;  %p1031_p2 = pnand %p1030_p1, %p1024_p12 }
  0x76   :  { %771 = vmatpush3.bf16.msra.mxu0 %v866_v23  ;;  %809 = vmatpush3.bf16.msra.mxu1 %v874_v44  ;;  %v905_v23 = vld [vmem:[#allocation10 + $0x64] ss:$8 sps:$4 sm:$0xff]  }
  0x77   :  { %772 = vmatprep.subr.bf16.mxu0 %v867_v24  ;;  %810 = vmatprep.subr.bf16.mxu1 %v1064_v27  ;;  %v903_v24 = vld [vmem:[#allocation10 + $0x60] ss:$8 sps:$4 sm:$0xff]  }
  0x7a   :  { %773 = vmatpush3.bf16.msra.mxu0 %v868_v25  ;;  %811 = vmatpush3.bf16.msra.mxu1 %v875_v45  ;;  %v908_v25 = vld [vmem:[#allocation10 + $0x74] ss:$8 sps:$4 sm:$0xff]  }
  0x7b   :  { %818 = vmatprep.subr.bf16.mxu0 %v1064_v27  ;;  %812 = vmatprep.subr.bf16.mxu1 %v1064_v27 }
  0x7e   :  { %813 = vmatpush3.bf16.msra.mxu1 %v876_v46 }
  0x7f   :  { %641 = vmatprep.subr.bf16.mxu1 %v887_v4 }
  0xed   :  { %v112_v32 = vpop.xlane.xlu0 %111 }
  0xee   :  { %v116_v33 = vmax.f32 %v112_v32, 1e-24 }
  0xf0   :  { %909 = vrsqrt.f32 %v116_v33 }
  0xf1   :  { %v115_v34 = vpop.xlane.xlu0 %114 }
  0xf2   :  { %v117_v35 = vmax.f32 %v115_v34, 1e-24 }
  0xf4   :  { %911 = vrsqrt.f32 %v117_v35 }
  0xfa   :  { %v910_v36 = vpop.eup %909 }
  0xfb   :  { %v121_v38 = vmul.f32 %v910_v36, %v1192_v1  ;;  %v120_v40 = vmul.f32 %v910_v36, %v1190_v0  ;;  %v883_v1 = vld [vmem:[#allocation8 + $0x30] sm:$0xff]  }
  0xfe   :  { %v912_v37 = vpop.eup %911 }
  0xff   :  { %v123_v39 = vmul.f32 %v912_v37, %v1200_v5  ;;  %v122_v41 = vmul.f32 %v912_v37, %v1194_v2  ;;  %v884_v2 = vld [vmem:[#allocation8 + $0x38] sm:$0xff]  }
 0x100   :  { %v890_v5 = vld [vmem:[#allocation10 + $0x14] ss:$8 sps:$4 sm:$0xff]  }
 0x101   :  { %v125_v42 = vpack.c.bf16 %v123_v39, %v121_v38  ;;  %v124_v43 = vpack.c.bf16 %v122_v41, %v120_v40  ;;  %v551_v38 = vlaneseq  ;;  %v549_v41 = vld [vmem:[%s1263_s8] sm:$0x3] }
 0x103   :  { %293 = vmatprep.mubr.bf16.mxu0 %v125_v42  ;;  %v552_v39 = vshrl.u32 %v551_v38, 7 }
 0x104   :  { %294 = vmatmul.mubr.bf16.vlgmr.msra.gmra.mrb[0].mxu0 %v124_v43 }
 0x105   :  { %834 = vmatprep.mubr.msk.bf16.mxu0 %vm1065_vm0, %v1064_v27  ;;  %819 = vmatpush3.bf16.msra.mxu0 %v877_v47  ;;  %v553_v40 = vsub.s32 0, %v552_v39  ;;  %v557_v42 = vsub.s32 1, %v552_v39 }
 0x106   :  { %820 = vmatprep.subr.bf16.mxu0 %v1064_v27 }
 0x107   :  { %v554_v43 = vrot.slane %v549_v41, %v553_v40  ;;  %v558_v44 = vrot.slane %v549_v41, %v557_v42 }
 0x109   :  { %821 = vmatpush3.bf16.msra.mxu0 %v878_v48 }
 0x10a   :  { %822 = vmatprep.subr.bf16.mxu0 %v1064_v27 }
 0x10d   :  { %823 = vmatpush3.bf16.msra.mxu0 %v879_v49 }
 0x10e   :  { %824 = vmatprep.subr.bf16.mxu0 %v1064_v27 }
 0x111   :  { %825 = vmatpush3.bf16.msra.mxu0 %v880_v50 }
 0x112   :  { %826 = vmatprep.subr.bf16.mxu0 %v1064_v27 }
 0x115   :  { %827 = vmatpush3.bf16.msra.mxu0 %v881_v51 }
 0x116   :  { %828 = vmatprep.subr.bf16.mxu0 %v1064_v27 }
 0x119   :  { %829 = vmatpush3.bf16.msra.mxu0 %v882_v52 }
 0x11a   :  { %830 = vmatprep.subr.bf16.mxu0 %v1064_v27 }
 0x11d   :  { %831 = vmatpush3.bf16.msra.mxu0 %v883_v1 }
 0x11e   :  { %832 = vmatprep.subr.bf16.mxu0 %v1064_v27  ;;  %v1066_v27 = vmov 0  }
 0x121   :  { %833 = vmatpush3.bf16.msra.mxu0 %v884_v2 }
 0x1d7   :  { %v774_v53 = vpop.f32.mrb[0].mxu0 }
 0x1d8   :  { %v775_v55 = vpop.f32.mrb[1].mxu0 }
 0x1d9   :  { %v776_v56 = vadd.f32 %v775_v55, %v774_v53  ;;  %v777_v57 = vpop.f32.mrb[2].mxu0 }
 0x1da   :  { %v778_v58 = vpop.f32.mrb[3].mxu0 }
 0x1db   :  { %v296_v59 = vadd.f32 %v776_v56, %v707_v54  ;;  %v779_v60 = vadd.f32 %v778_v58, %v777_v57 }
 0x1dd   :  { %v299_v61 = vadd.f32 %v779_v60, %v707_v54  ;;  %v302_v62 = vmax.f32 %v296_v59, 0.0 }
 0x1df   :  { %v303_v63 = vmax.f32 %v299_v61, 0.0 }
 0x1e1   :  { %v304_v0 = vpack.c.bf16 %v303_v63, %v302_v62 }
 0x1e3   :  { %815 = vmatmul.mubr.bf16.vlgmr.msra.gmra.mrb[0].mxu1 %v304_v0 }
 0x1e4   :  { %642 = vmatpush1.bf16.msra.mxu1 %v885_v3  ;;  %673 = vmatprep.mubr.bf16.mxu1 %v1066_v27 }
 0x1e5   :  { %643 = vmatprep.subr.bf16.mxu1 %v890_v5 }
 0x1e8   :  { %644 = vmatpush1.bf16.msra.mxu1 %v888_v6 }
 0x1e9   :  { %645 = vmatprep.subr.bf16.mxu1 %v893_v7 }
 0x1ec   :  { %646 = vmatpush1.bf16.msra.mxu1 %v891_v8 }
 0x1ed   :  { %647 = vmatprep.subr.bf16.mxu1 %v896_v9 }
 0x1f0   :  { %648 = vmatpush1.bf16.msra.mxu1 %v894_v10 }
 0x1f1   :  { %649 = vmatprep.subr.bf16.mxu1 %v899_v11 }
 0x1f4   :  { %650 = vmatpush1.bf16.msra.mxu1 %v897_v12 }
 0x1f5   :  { %651 = vmatprep.subr.bf16.mxu1 %v902_v13 }
 0x1f8   :  { %652 = vmatpush1.bf16.msra.mxu1 %v900_v14 }
 0x1f9   :  { %653 = vmatprep.subr.bf16.mxu1 %v905_v23 }
 0x1fc   :  { %654 = vmatpush1.bf16.msra.mxu1 %v903_v24 }
 0x1fd   :  { %655 = vmatprep.subr.bf16.mxu1 %v908_v25 }
 0x200   :  { %656 = vmatpush1.bf16.msra.mxu1 %v906_v26 }
 0x2b6   :  { %v410_v16 = vpop.f32.mrb[0].mxu1 }
 0x2b7   :  { %v816_v17 = vpop.f32.mrb[1].mxu1  ;;  %v411_v19 = vadd.f32 %v724_v15, %v410_v16 }
 0x2b8   :  { %v413_v18 = vpop.f32.mrb[2].mxu1 }
 0x2b9   :  { %v414_v20 = vadd.f32 %v724_v15, %v413_v18  ;;  %v817_v21 = vpop.f32.mrb[3].mxu1 }
 0x2bb   :  { %v417_v22 = vpack.c.bf16 %v414_v20, %v411_v19 }
 0x2bd   :  { %835 = vmatmul.mubr.bf16.vlgmr.msra.gmra.mrb[4].mxu0 %v417_v22 }
 0x390   :  { %v523_v29 = vpop.f32.mrb[4].mxu0 }
 0x391   :  { %v524_v30 = vadd.f32 %v733_v28, %v523_v29  ;;  %v836_v31 = vpop.f32.mrb[5].mxu0 }
 0x392   :  { %v526_v32 = vpop.f32.mrb[6].mxu0 }
 0x393   :  { %v527_v33 = vadd.f32 %v733_v28, %v526_v32  ;;  %v837_v34 = vpop.f32.mrb[7].mxu0  ;;  %v530_v35 = vmax.f32 %v524_v30, 0.0 }
 0x395   :  { %v531_v36 = vmax.f32 %v527_v33, 0.0 }
 0x397   :  { %v532_v37 = vpack.c.bf16 %v531_v36, %v530_v35 }
 0x399   :  { %674 = vmatmul.mubr.bf16.vlgmr.msra.gmra.mrb[4].mxu1 %v532_v37 }
 0x46c   :  { %v675_v45 = vpop.f32.mrb[4].mxu1 }
 0x46d   :  { %v676_v46 = vadd.f32 %v675_v45, %v554_v43  ;;  %v677_v47 = vpop.f32.mrb[5].mxu1 }
 0x46e   :  { %v678_v48 = vadd.f32 %v677_v47, %v558_v44  ;;  %v679_v49 = vpop.f32.mrb[6].mxu1 }
 0x46f   :  { %684 = vst [vmem:[#allocation11] sm:$0xff] %v676_v46  ;;  %v680_v50 = vadd.f32 %v679_v49, %v554_v43  ;;  %v681_v51 = vpop.f32.mrb[7].mxu1 }
 0x470   :  { %685 = vst [vmem:[#allocation11 + $0x8] sm:$0xff] %v678_v48  ;;  %v682_v52 = vadd.f32 %v681_v51, %v558_v44 }
 0x471   :  { %686 = vst [vmem:[#allocation11 + $0x10] sm:$0xff] %v680_v50 }
 0x472   :  { %687 = vst [vmem:[#allocation11 + $0x18] sm:$0xff] %v682_v52 }
 0x473   :  { %1034 = shalt.err (!%p1031_p2)
}
 0x474   :  { %s1035_s0 = scalar_lea.hbm %s1264_s9, 512 }
 0x475   :  { %p1036_p3 = scmp.ne.s32.totalorder %s1264_s9, %s1035_s0  ;;  %p1039_p4 = scmp.lt.u32.totalorder %s1035_s0, %s1264_s9 }
 0x477   :  { %p1041_p5 = pnand %p1039_p4, %p1036_p3 }
 0x479   :  { %1044 = shalt.err (!%p1041_p5)
}
 0x47a   :  { %699 = dma.vmem_to_hbm [thread:$0]  %s694_s15, 512, %s1264_s9, [#allocation4], %s1058_s5, %s1058_s5, %s1059_s24  }
 0x47b   :  { %1051 = dma.done.wait [#allocation4], 512  }
 0x47c   :  { %1052 = vsyncadd [#allocation4], 4294966784 }
 0x47d   :  { %703 = vsyncpa [#allocation3], 1 }
 0x47e   :  { %704 = vsyncpa [#allocation6], 1 }
 0x47f   :  { %705 = vsyncpa [#allocation9], 1 }
 0x480   :  { %706 = vsyncpa [#allocation4], 1 }

</bundles_post_ra>
